<compile_context>
chip_gen: v5e
topology: v5e:2x2
jax: 0.10.0
libtpu: 0.0.40
codegen_flags: <defaults>
</compile_context>

<pallas_src>
import jax
import jax.numpy as jnp
from jax.experimental import pallas as pl
from jax.experimental.pallas import tpu as pltpu


def _attention_kernel(enc_ref, h_ref, w_ref, b_ref, o_ref):
    # enc_ref: (S, TB, E)  encoder-state block (native layout)
    # h_ref:   (TB, D)     decoder hidden block
    # w_ref:   (E, D)      transposed Linear weight (resident, single-buffered)
    # b_ref:   (1, D)      Linear bias, f32 (resident, single-buffered)
    # o_ref:   (TB, D)     attention output block
    enc = enc_ref[...].astype(jnp.float32)                      # VPU math in f32

    # u[b, e] = sum_d h[b, d] * w_t[e, d] : contract the last dims of both
    # (same NT pattern as flash-attention's q.k^T) -- small MXU matmul.
    u = jax.lax.dot_general(
        h_ref[...], w_ref[...],
        dimension_numbers=(((1,), (1,)), ((), ())),
        preferred_element_type=jnp.float32)                     # (TB, E)

    # logits[s, b] = enc[s, b, :] . u[b, :]   (bias.h is constant over S and
    # cancels in the softmax).  VPU multiply + cross-lane reduce; MXU idle.
    # TODO(synk): for S in the hundreds, move the softmax to a dense (TB, S)
    # lane layout instead of (S, TB, 1) to avoid lane-sparse exp.
    logits = jnp.sum(enc * u[None, :, :], axis=-1, keepdims=True)   # (S, TB, 1)

    # Numerically-stable softmax over the sequence axis.  EXACT reciprocal so
    # sum(scores) == 1 holds tightly (the factored bias term depends on it);
    # denom is a single tiny vreg, so this costs essentially nothing.
    m = jnp.max(logits, axis=0, keepdims=True)                  # (1, TB, 1)
    e = jnp.exp(logits - m)                                     # (S, TB, 1)
    denom = jnp.sum(e, axis=0, keepdims=True)                   # (1, TB, 1)
    scores = e / denom                                          # (S, TB, 1)

    # Weighted sum of the RAW encoder states, then a single projection:
    #   ctx = (sum_s scores * enc) @ W + b
    wenc = jnp.sum(scores * enc, axis=0)                        # (TB, E)
    ctx = jnp.dot(wenc.astype(w_ref.dtype), w_ref[...],
                  preferred_element_type=jnp.float32)           # (TB, D)
    ctx = ctx + b_ref[...].astype(jnp.float32)
    o_ref[...] = ctx.astype(o_ref.dtype)


def _tpu_vmem_and_cores():
    """(physical VMEM bytes, TensorCores per device), conservative fallbacks."""
    vmem_cap = 64 * 1024 * 1024          # v7x floor: safe on every generation
    cores = 1
    try:
        info = pltpu.get_tpu_info()
        vmem_cap = int(getattr(info, "vmem_capacity_bytes", vmem_cap))
        for name in ("num_tensorcores", "tensorcores_per_chip",
                     "num_cores", "core_count"):
            v = getattr(info, name, None)
            if v:
                cores = int(v)
                break
    except Exception:
        pass
    if cores == 1:
        try:
            kind = jax.devices()[0].device_kind.lower()
            # megacore-style parts expose 2 TensorCores behind one device
            if any(t in kind for t in ("v7", "v5p", "v4")):
                cores = 2
        except Exception:
            pass
    return vmem_cap, cores


def _choose_batch_block(batch, seq, enc_dim, dec_dim,
                        in_itemsize, out_itemsize, vmem_budget, cores):
    """Pick TB = batch elements per grid step.

    * TB divides B and is either the whole batch or a multiple of 8, so the
      (.., TB, E) block obeys the (8, 128) sublane rule.
    * Largest TB whose per-step VMEM footprint (double-buffered pipelined
      blocks + resident weights + live f32 intermediates) fits the budget --
      single-TC chips (v5e/v6e) take this directly (no forced splitting).
    * On multi-TC chips, prefer a step count that is a multiple of the core
      count so the "parallel" batch axis splits evenly across TensorCores.
    """
    valid = [d for d in range(1, batch + 1)
             if batch % d == 0 and (d == batch or d % 8 == 0)]

    def footprint(tb):
        pipelined = 2 * (seq * tb * enc_dim * in_itemsize      # enc block
                         + tb * dec_dim * in_itemsize          # hidden block
                         + tb * dec_dim * out_itemsize)        # output block
        resident = 2 * (enc_dim * dec_dim * in_itemsize + dec_dim * 4)
        live_f32 = 2 * seq * tb * enc_dim * 4 + 4 * tb * max(enc_dim, dec_dim) * 4
        return pipelined + resident + live_f32

    fits = [d for d in valid if footprint(d) <= vmem_budget] or valid[:1]
    tb = fits[-1]
    if cores >= 2:
        even = [d for d in fits if (batch // d) % cores == 0]
        if even:
            tb = even[-1]
    return tb


def attention_forward(encoder_states, decoder_hidden, w_t, bias, *,
                      batch_block=None, mxu_dtype=None):
    """encoder_states: (S, B, E); decoder_hidden: (1, B, D);
    w_t: (E, D) = Linear weight transposed; bias: (D,).
    Returns (1, B, D), matching the PyTorch module's output.

    mxu_dtype=jnp.bfloat16 feeds enc/hidden/weight to the MXU in bf16 (halves
    HBM traffic of the dominant enc read); accumulation stays f32 and all
    VPU/softmax math is upcast in-kernel (v5e-safe)."""
    S, B, E = encoder_states.shape
    D = w_t.shape[1]
    assert decoder_hidden.shape == (1, B, D)

    out_dtype = encoder_states.dtype
    hid = decoder_hidden[0]                       # (B, D): size-1 squeeze only
    bias2 = bias.reshape(1, D).astype(jnp.float32)
    if mxu_dtype is not None:
        encoder_states = encoder_states.astype(mxu_dtype)
        hid = hid.astype(mxu_dtype)
        w_t = w_t.astype(mxu_dtype)

    vmem_cap, cores = _tpu_vmem_and_cores()
    # ~3/4 of physical VMEM: ~96 MiB on v5e/v6e (128 MiB), ~48 MiB on v7x (64 MiB).
    vmem_limit = max(32 * 1024 * 1024,
                     min(vmem_cap * 3 // 4, 96 * 1024 * 1024))

    if batch_block is not None:
        tb = batch_block
    else:
        tb = _choose_batch_block(
            B, S, E, D,
            encoder_states.dtype.itemsize, jnp.dtype(out_dtype).itemsize,
            int(vmem_limit * 0.8), cores)
    assert B % tb == 0
    grid = (B // tb,)

    def _call(single_buffer_weights):
        if single_buffer_weights:
            # Constant block index -> single buffer; default double-buffering
            # would only burn E*D*itemsize extra VMEM.
            w_spec = pl.BlockSpec((E, D), lambda i: (0, 0),
                                  pipeline_mode=pl.Buffered(1))
            b_spec = pl.BlockSpec((1, D), lambda i: (0, 0),
                                  pipeline_mode=pl.Buffered(1))
        else:
            w_spec = pl.BlockSpec((E, D), lambda i: (0, 0))
            b_spec = pl.BlockSpec((1, D), lambda i: (0, 0))
        return pl.pallas_call(
            _attention_kernel,
            out_shape=jax.ShapeDtypeStruct((B, D), out_dtype),
            grid_spec=pltpu.PrefetchScalarGridSpec(
                num_scalar_prefetch=0,
                grid=grid,
                in_specs=[
                    pl.BlockSpec((S, tb, E), lambda i: (0, i, 0)),  # enc slab
                    pl.BlockSpec((tb, D), lambda i: (i, 0)),        # hidden
                    w_spec,                                         # weight
                    b_spec,                                         # bias
                ],
                out_specs=pl.BlockSpec((tb, D), lambda i: (i, 0)),  # dense slabs
            ),
            compiler_params=pltpu.CompilerParams(
                dimension_semantics=("parallel",),   # batch blocks independent
                vmem_limit_bytes=int(vmem_limit),
            ),
        )(encoder_states, hid, w_t, bias2)

    try:
        out = _call(True)
    except Exception:
        # Fallback if this Pallas build does not honor pipeline_mode on
        # pallas_call BlockSpecs (constant blocks -> numerics unaffected).
        out = _call(False)

    return out[None, :, :]   # (1, B, D)


def attention_reference(encoder_states, decoder_hidden, w_t, bias):
    """Pure-JAX reference mirroring the PyTorch forward (unfactored)."""
    proj = jnp.einsum("sbe,ed->sbd", encoder_states.astype(jnp.float32),
                      w_t.astype(jnp.float32)) + bias             # (S, B, D)
    enc_bsd = jnp.transpose(proj, (1, 0, 2))                      # (B, S, D)
    hid_bd1 = jnp.transpose(decoder_hidden, (1, 2, 0)).astype(jnp.float32)
    weights = jnp.matmul(enc_bsd, hid_bd1)[..., 0]                # (B, S)
    scores = jax.nn.softmax(weights, axis=1)[..., None]           # (B, S, 1)
    enc_bds = jnp.transpose(enc_bsd, (0, 2, 1))                   # (B, D, S)
    weighted = jnp.matmul(enc_bds, scores)                        # (B, D, 1)
    return jnp.transpose(weighted, (2, 0, 1))                     # (1, B, D)


if __name__ == "__main__":
    # Small, TPU-friendly shapes: seq=8, batch=16, enc_dim=32, dec_dim=32.
    S, B, ENC_DIM, DEC_DIM = 8, 16, 32, 32

    key = jax.random.PRNGKey(0)
    k_w, k_b, k_enc, k_hid = jax.random.split(key, 4)

    # Deterministic parameters (Linear(enc_dim, dec_dim)); w_t is W^T: (E, D).
    w_t = jax.random.normal(k_w, (ENC_DIM, DEC_DIM), jnp.float32) * 0.1
    bias = jax.random.normal(k_b, (DEC_DIM,), jnp.float32) * 0.1

    encoder_states = jax.random.normal(k_enc, (S, B, ENC_DIM), jnp.float32)
    decoder_hidden = jax.random.normal(k_hid, (1, B, DEC_DIM), jnp.float32)

    # Default f32 path matches the PyTorch module; pass
    # mxu_dtype=jnp.bfloat16 for the reduced-HBM-traffic variant.
    out = attention_forward(encoder_states, decoder_hidden, w_t, bias)
    out = jax.block_until_ready(out)

    ref = attention_reference(encoder_states, decoder_hidden, w_t, bias)
    assert out.shape == (1, B, DEC_DIM), out.shape
    # Factored (ctx = (sum scores*enc) @ W + b) vs unfactored reference agree
    # to f32 rounding; softmax uses an exact reciprocal.
    assert jnp.allclose(out, ref, atol=1e-4, rtol=1e-4), "mismatch vs reference"

    print("KERNEL_OK")
</pallas_src>

<mosaic_0001>
module attributes {stable_mosaic.version = 11 : i64} {
  func.func @_attention_kernel(%arg0: i32, %arg1: memref<8x16x32xf32, #tpu.memory_space<vmem>>, %arg2: memref<16x32xf32, #tpu.memory_space<vmem>>, %arg3: memref<32x32xf32, #tpu.memory_space<vmem>>, %arg4: memref<1x32xf32, #tpu.memory_space<vmem>>, %arg5: memref<16x32xf32, #tpu.memory_space<vmem>>) attributes {dimension_semantics = [#tpu.dimension_semantics<parallel>], iteration_bounds = array<i64: 1>, scalar_prefetch = 0 : i64, scratch_operands = 0 : i64, tpu.core_type = #tpu.core_type<tc>, window_params = [{transform_indices = @transform_0, window_bounds = array<i64: 8, 16, 32>}, {transform_indices = @transform_1, window_bounds = array<i64: 16, 32>}, {pipeline_mode = #tpu.pipeline_mode<synchronous>, transform_indices = @transform_2, window_bounds = array<i64: 32, 32>}, {pipeline_mode = #tpu.pipeline_mode<synchronous>, transform_indices = @transform_3, window_bounds = array<i64: 1, 32>}, {transform_indices = @transform_4, window_bounds = array<i64: 16, 32>}]} {
    %c0 = arith.constant 0 : index
    %c0_0 = arith.constant 0 : index
    %c0_1 = arith.constant 0 : index
    %0 = vector.load %arg1[%c0, %c0_0, %c0_1] : memref<8x16x32xf32, #tpu.memory_space<vmem>>, vector<8x16x32xf32>
    %c0_2 = arith.constant 0 : index
    %c0_3 = arith.constant 0 : index
    %1 = vector.load %arg2[%c0_2, %c0_3] : memref<16x32xf32, #tpu.memory_space<vmem>>, vector<16x32xf32>
    %c0_4 = arith.constant 0 : index
    %c0_5 = arith.constant 0 : index
    %2 = vector.load %arg3[%c0_4, %c0_5] : memref<32x32xf32, #tpu.memory_space<vmem>>, vector<32x32xf32>
    %cst = arith.constant dense<0.000000e+00> : vector<16x32xf32>
    %3 = tpu.matmul %1, %2, %cst {dimension_numbers = #tpu.dot_dimension_numbers<[1], [1], [0], [0], [0, 0, 1, 0], [], []>} : vector<16x32xf32>, vector<32x32xf32>, vector<16x32xf32> -> vector<16x32xf32>
    %4 = vector.shape_cast %3 : vector<16x32xf32> to vector<1x16x32xf32>
    %5 = vector.broadcast %4 : vector<1x16x32xf32> to vector<8x16x32xf32>
    %6 = arith.mulf %0, %5 : vector<8x16x32xf32>
    %cst_6 = arith.constant dense<0.000000e+00> : vector<8x16xf32>
    %7 = vector.multi_reduction <add>, %6, %cst_6 [2] : vector<8x16x32xf32> to vector<8x16xf32>
    %8 = vector.shape_cast %7 : vector<8x16xf32> to vector<8x16x1xf32>
    %cst_7 = arith.constant dense<0xFF800000> : vector<16x1xf32>
    %9 = vector.multi_reduction <maximumf>, %8, %cst_7 [0] : vector<8x16x1xf32> to vector<16x1xf32>
    %10 = vector.shape_cast %9 : vector<16x1xf32> to vector<1x16x1xf32>
    %11 = vector.broadcast %10 : vector<1x16x1xf32> to vector<8x16x1xf32>
    %12 = arith.subf %8, %11 : vector<8x16x1xf32>
    %13 = math.exp %12 : vector<8x16x1xf32>
    %cst_8 = arith.constant dense<0.000000e+00> : vector<16x1xf32>
    %14 = vector.multi_reduction <add>, %13, %cst_8 [0] : vector<8x16x1xf32> to vector<16x1xf32>
    %15 = vector.shape_cast %14 : vector<16x1xf32> to vector<1x16x1xf32>
    %16 = vector.broadcast %15 : vector<1x16x1xf32> to vector<8x16x1xf32>
    %17 = arith.divf %13, %16 : vector<8x16x1xf32>
    %18 = vector.broadcast %17 : vector<8x16x1xf32> to vector<8x16x32xf32>
    %19 = arith.mulf %18, %0 : vector<8x16x32xf32>
    %cst_9 = arith.constant dense<0.000000e+00> : vector<16x32xf32>
    %20 = vector.multi_reduction <add>, %19, %cst_9 [0] : vector<8x16x32xf32> to vector<16x32xf32>
    %c0_10 = arith.constant 0 : index
    %c0_11 = arith.constant 0 : index
    %21 = vector.load %arg3[%c0_10, %c0_11] : memref<32x32xf32, #tpu.memory_space<vmem>>, vector<32x32xf32>
    %cst_12 = arith.constant dense<0.000000e+00> : vector<16x32xf32>
    %22 = tpu.matmul %20, %21, %cst_12 {dimension_numbers = #tpu.dot_dimension_numbers<[1], [0], [0], [1], [0, 0, 1, 1], [], []>} : vector<16x32xf32>, vector<32x32xf32>, vector<16x32xf32> -> vector<16x32xf32>
    %c0_13 = arith.constant 0 : index
    %c0_14 = arith.constant 0 : index
    %23 = vector.load %arg4[%c0_13, %c0_14] : memref<1x32xf32, #tpu.memory_space<vmem>>, vector<1x32xf32>
    %24 = vector.broadcast %23 : vector<1x32xf32> to vector<16x32xf32>
    %25 = arith.addf %22, %24 : vector<16x32xf32>
    %c0_15 = arith.constant 0 : index
    %c0_16 = arith.constant 0 : index
    %26 = vector.load %arg5[%c0_15, %c0_16] : memref<16x32xf32, #tpu.memory_space<vmem>>, vector<16x32xf32>
    tpu.vector_store %arg5[%c0_15, %c0_16], %25 {strides = array<i32>} : memref<16x32xf32, #tpu.memory_space<vmem>>, vector<16x32xf32>,
    return
  }
  func.func @transform_0(%arg0: i32) -> (i32, i32, i32) {
    %c0_i32 = arith.constant 0 : i32
    %c0_i32_0 = arith.constant 0 : i32
    %c0_i32_1 = arith.constant 0 : i32
    return %c0_i32, %arg0, %c0_i32_0 : i32, i32, i32
  }
  func.func @transform_1(%arg0: i32) -> (i32, i32) {
    %c0_i32 = arith.constant 0 : i32
    %c0_i32_0 = arith.constant 0 : i32
    return %arg0, %c0_i32 : i32, i32
  }
  func.func @transform_2(%arg0: i32) -> (i32, i32) {
    %c0_i32 = arith.constant 0 : i32
    %c0_i32_0 = arith.constant 0 : i32
    %c0_i32_1 = arith.constant 0 : i32
    return %c0_i32, %c0_i32_0 : i32, i32
  }
  func.func @transform_3(%arg0: i32) -> (i32, i32) {
    %c0_i32 = arith.constant 0 : i32
    %c0_i32_0 = arith.constant 0 : i32
    %c0_i32_1 = arith.constant 0 : i32
    return %c0_i32, %c0_i32_0 : i32, i32
  }
  func.func @transform_4(%arg0: i32) -> (i32, i32) {
    %c0_i32 = arith.constant 0 : i32
    %c0_i32_0 = arith.constant 0 : i32
    return %arg0, %c0_i32 : i32, i32
  }
}

module attributes {stable_mosaic.version = 11 : i64} {
  func.func @_attention_kernel(%arg0: i32, %arg1: memref<8x16x32xf32, #tpu.memory_space<vmem>>, %arg2: memref<16x32xf32, #tpu.memory_space<vmem>>, %arg3: memref<32x32xf32, #tpu.memory_space<vmem>>, %arg4: memref<1x32xf32, #tpu.memory_space<vmem>>, %arg5: memref<16x32xf32, #tpu.memory_space<vmem>>) attributes {dimension_semantics = [#tpu.dimension_semantics<parallel>], iteration_bounds = array<i64: 1>, scalar_prefetch = 0 : i64, scratch_operands = 0 : i64, tpu.core_type = #tpu.core_type<tc>, window_params = [{transform_indices = @transform_0, window_bounds = array<i64: 8, 16, 32>}, {transform_indices = @transform_1, window_bounds = array<i64: 16, 32>}, {pipeline_mode = #tpu.pipeline_mode<synchronous>, transform_indices = @transform_2, window_bounds = array<i64: 32, 32>}, {pipeline_mode = #tpu.pipeline_mode<synchronous>, transform_indices = @transform_3, window_bounds = array<i64: 1, 32>}, {transform_indices = @transform_4, window_bounds = array<i64: 16, 32>}]} {
    %c0 = arith.constant 0 : index
    %c0_0 = arith.constant 0 : index
    %c0_1 = arith.constant 0 : index
    %0 = vector.load %arg1[%c0, %c0_0, %c0_1] : memref<8x16x32xf32, #tpu.memory_space<vmem>>, vector<8x16x32xf32>
    %c0_2 = arith.constant 0 : index
    %c0_3 = arith.constant 0 : index
    %1 = vector.load %arg2[%c0_2, %c0_3] : memref<16x32xf32, #tpu.memory_space<vmem>>, vector<16x32xf32>
    %c0_4 = arith.constant 0 : index
    %c0_5 = arith.constant 0 : index
    %2 = vector.load %arg3[%c0_4, %c0_5] : memref<32x32xf32, #tpu.memory_space<vmem>>, vector<32x32xf32>
    %cst = arith.constant dense<0.000000e+00> : vector<16x32xf32>
    %3 = tpu.matmul %1, %2, %cst {dimension_numbers = #tpu.dot_dimension_numbers<[1], [1], [0], [0], [0, 0, 1, 0], [], []>} : vector<16x32xf32>, vector<32x32xf32>, vector<16x32xf32> -> vector<16x32xf32>
    %4 = vector.shape_cast %3 : vector<16x32xf32> to vector<1x16x32xf32>
    %5 = vector.broadcast %4 : vector<1x16x32xf32> to vector<8x16x32xf32>
    %6 = arith.mulf %0, %5 : vector<8x16x32xf32>
    %cst_6 = arith.constant dense<0.000000e+00> : vector<8x16xf32>
    %7 = vector.multi_reduction <add>, %6, %cst_6 [2] : vector<8x16x32xf32> to vector<8x16xf32>
    %8 = vector.shape_cast %7 : vector<8x16xf32> to vector<8x16x1xf32>
    %cst_7 = arith.constant dense<0xFF800000> : vector<16x1xf32>
    %9 = vector.multi_reduction <maximumf>, %8, %cst_7 [0] : vector<8x16x1xf32> to vector<16x1xf32>
    %10 = vector.shape_cast %9 : vector<16x1xf32> to vector<1x16x1xf32>
    %11 = vector.broadcast %10 : vector<1x16x1xf32> to vector<8x16x1xf32>
    %12 = arith.subf %8, %11 : vector<8x16x1xf32>
    %13 = math.exp %12 : vector<8x16x1xf32>
    %cst_8 = arith.constant dense<0.000000e+00> : vector<16x1xf32>
    %14 = vector.multi_reduction <add>, %13, %cst_8 [0] : vector<8x16x1xf32> to vector<16x1xf32>
    %15 = vector.shape_cast %14 : vector<16x1xf32> to vector<1x16x1xf32>
    %16 = vector.broadcast %15 : vector<1x16x1xf32> to vector<8x16x1xf32>
    %17 = arith.divf %13, %16 : vector<8x16x1xf32>
    %18 = vector.broadcast %17 : vector<8x16x1xf32> to vector<8x16x32xf32>
    %19 = arith.mulf %18, %0 : vector<8x16x32xf32>
    %cst_9 = arith.constant dense<0.000000e+00> : vector<16x32xf32>
    %20 = vector.multi_reduction <add>, %19, %cst_9 [0] : vector<8x16x32xf32> to vector<16x32xf32>
    %c0_10 = arith.constant 0 : index
    %c0_11 = arith.constant 0 : index
    %21 = vector.load %arg3[%c0_10, %c0_11] : memref<32x32xf32, #tpu.memory_space<vmem>>, vector<32x32xf32>
    %cst_12 = arith.constant dense<0.000000e+00> : vector<16x32xf32>
    %22 = tpu.matmul %20, %21, %cst_12 {dimension_numbers = #tpu.dot_dimension_numbers<[1], [0], [0], [1], [0, 0, 1, 1], [], []>} : vector<16x32xf32>, vector<32x32xf32>, vector<16x32xf32> -> vector<16x32xf32>
    %c0_13 = arith.constant 0 : index
    %c0_14 = arith.constant 0 : index
    %23 = vector.load %arg4[%c0_13, %c0_14] : memref<1x32xf32, #tpu.memory_space<vmem>>, vector<1x32xf32>
    %24 = vector.broadcast %23 : vector<1x32xf32> to vector<16x32xf32>
    %25 = arith.addf %22, %24 : vector<16x32xf32>
    %c0_15 = arith.constant 0 : index
    %c0_16 = arith.constant 0 : index
    %26 = vector.load %arg5[%c0_15, %c0_16] : memref<16x32xf32, #tpu.memory_space<vmem>>, vector<16x32xf32>
    tpu.vector_store %arg5[%c0_15, %c0_16], %25 {strides = array<i32>} : memref<16x32xf32, #tpu.memory_space<vmem>>, vector<16x32xf32>,
    return
  }
  func.func @transform_0(%arg0: i32) -> (i32, i32, i32) {
    %c0_i32 = arith.constant 0 : i32
    %c0_i32_0 = arith.constant 0 : i32
    %c0_i32_1 = arith.constant 0 : i32
    return %c0_i32, %arg0, %c0_i32_0 : i32, i32, i32
  }
  func.func @transform_1(%arg0: i32) -> (i32, i32) {
    %c0_i32 = arith.constant 0 : i32
    %c0_i32_0 = arith.constant 0 : i32
    return %arg0, %c0_i32 : i32, i32
  }
  func.func @transform_2(%arg0: i32) -> (i32, i32) {
    %c0_i32 = arith.constant 0 : i32
    %c0_i32_0 = arith.constant 0 : i32
    %c0_i32_1 = arith.constant 0 : i32
    return %c0_i32, %c0_i32_0 : i32, i32
  }
  func.func @transform_3(%arg0: i32) -> (i32, i32) {
    %c0_i32 = arith.constant 0 : i32
    %c0_i32_0 = arith.constant 0 : i32
    %c0_i32_1 = arith.constant 0 : i32
    return %c0_i32, %c0_i32_0 : i32, i32
  }
  func.func @transform_4(%arg0: i32) -> (i32, i32) {
    %c0_i32 = arith.constant 0 : i32
    %c0_i32_0 = arith.constant 0 : i32
    return %arg0, %c0_i32 : i32, i32
  }
}

</mosaic_0001>

<bundles_post_ra>
// kernel: tpu_custom_call.1
= control target key start
LH: loop header
LB: loop body
LE: loop exit
PB: predicated region body
PF: predicated region fallthrough
CT: control target
= control target key end

     0   :  { %9 = vsyncpa [#allocation3], 0  ;;  %s787_s0 = inlined_call_operand.hbm [shape: f32[8,16,32], index: 0, kind: input, shape index: {}]   ;;  %s788_s1 = inlined_call_operand.hbm [shape: f32[16,32], index: 1, kind: input, shape index: {}]   ;;  %s789_s2 = inlined_call_operand.hbm [shape: f32[32,32], index: 2, kind: input, shape index: {}]   ;;  %s790_s3 = inlined_call_operand.vmem [shape: f32[1,32], index: 3, kind: input, shape index: {}]   ;;  %s791_s4 = inlined_call_operand.hbm [shape: f32[16,32], index: 4, kind: output, shape index: {}]  }
   0x1   :  { %10 = vsyncpa [#allocation6], 0 }
   0x2   :  { %11 = vsyncpa [#allocation4], 0  ;;  %s29_s17 = sshll.u32 %s788_s1, 4  ;;  %s571_s18 = smov [#allocation5]   ;;  %s30_s17 = int_to_ptr.hbm [resolvable:$true] %s29_s17 }
   0x3   :  { %s31_s19 = sshll.u32 %s571_s18, 4  ;;  %s16_s22 = sshll.u32 %s787_s0, 4  ;;  %s32_s19 = int_to_ptr.vmem [resolvable:$true] %s31_s19  ;;  %s17_s22 = int_to_ptr.hbm [resolvable:$true] %s16_s22 }
   0x4   :  { %s572_s23 = smov 128   ;;  %s573_s24 = smov 8  }
   0x5   :  { %37 = dma.hbm_to_vmem [thread:$0]  %s30_s17, 256, %s32_s19, [#allocation6], %s572_s23, %s572_s23, %s573_s24  }
   0x6   :  { %s574_s25 = smov [#allocation2]   ;;  %s42_s1 = sshll.u32 %s789_s2, 4  ;;  %s43_s1 = int_to_ptr.hbm [resolvable:$true] %s42_s1 }
   0x7   :  { %s18_s26 = sshll.u32 %s574_s25, 4  ;;  %s575_s0 = smov [#allocation7]   ;;  %s19_s26 = int_to_ptr.vmem [resolvable:$true] %s18_s26 }
   0x8   :  { %24 = dma.hbm_to_vmem [thread:$0]  %s17_s22, 2048, %s19_s26, [#allocation3], %s572_s23, %s572_s23, %s573_s24  }
   0x9   :  { %s44_s29 = sshll.u32 %s575_s0, 4  ;;  %s45_s29 = int_to_ptr.vmem [resolvable:$true] %s44_s29 }
   0xa   :  { %50 = dma.hbm_to_vmem [thread:$0]  %s43_s1, 512, %s45_s29, [#allocation6], %s572_s23, %s572_s23, %s573_s24  }
   0xb   :  { %565 = dma.done.wait [#allocation3], 2048  }
   0xc   :  { %566 = vsyncadd [#allocation3], 4294965248 }
   0xd   :  { %567 = dma.done.wait [#allocation6], 768  }
   0xe   :  { %568 = vsyncadd [#allocation6], 4294966528  ;;  %vm87_vm0 = vcmask 261120   ;;  %v86_v0 = vld [vmem:[#allocation7 + $0x18] sm:$0xff]  ;;  %v85_v1 = vld [vmem:[#allocation7 + $0x10] sm:$0xff]  ;;  %s576_s5 = smov [#allocation8]  }
   0xf   :  { %414 = vmatpush.xpose.msk.msra.mxu0 %vm87_vm0, %v86_v0  ;;  %422 = vmatpush.xpose.msk.msra.mxu2 %vm87_vm0, %v86_v0  ;;  %v84_v2 = vld [vmem:[#allocation7 + $0x8] sm:$0xff]  ;;  %v83_v3 = vld [vmem:[#allocation7] sm:$0xff]  ;;  %v81_v4 = vld [vmem:[#allocation5] sm:$0xff]  ;;  %s398_s6 = sshll.u32 %s576_s5, 4  ;;  %s400_s9 = sshll.u32 %s791_s4, 4  ;;  %s399_s6 = int_to_ptr.vmem [resolvable:$true] %s398_s6  ;;  %s401_s9 = int_to_ptr.hbm [resolvable:$true] %s400_s9 }
  0x10   :  { %381 = vmatpush.msra.mxu1 %v86_v0  ;;  %v82_v5 = vld [vmem:[#allocation5 + $0x8] sm:$0xff]  ;;  %v630_v6 = vld [vmem:[#allocation2 + $0x40] sm:$0xff]  ;;  %v642_v16 = vld [vmem:[#allocation2 + $0x50] sm:$0xff] }
  0x11   :  { %v632_v7 = vld [vmem:[#allocation2 + $0x20] sm:$0xff]  ;;  %v644_v17 = vld [vmem:[#allocation2 + $0x30] sm:$0xff]  ;;  %v651_v23 = vld [vmem:[#allocation2 + $0x8] sm:$0xff] }
  0x12   :  { %382 = vmatpush.msra.mxu1 %v85_v1  ;;  %v634_v8 = vld [vmem:[#allocation2] sm:$0xff]  ;;  %v646_v18 = vld [vmem:[#allocation2 + $0x10] sm:$0xff]  ;;  %v664_v33 = vld [vmem:[#allocation2 + $0x28] sm:$0xff] }
  0x13   :  { %415 = vmatpush.xpose.msk.msra.mxu0 %vm87_vm0, %v85_v1  ;;  %423 = vmatpush.xpose.msk.msra.mxu2 %vm87_vm0, %v85_v1  ;;  %v656_v27 = vld [vmem:[#allocation2 + $0x70] sm:$0xff]  ;;  %v659_v29 = vld [vmem:[#allocation2 + $0x60] sm:$0xff]  ;;  %v666_v34 = vld [vmem:[#allocation2 + $0x38] sm:$0xff] }
  0x14   :  { %383 = vmatpush.msra.mxu1 %v84_v2  ;;  %v669_v36 = vld [vmem:[#allocation2 + $0x18] sm:$0xff]  ;;  %v680_v45 = vld [vmem:[#allocation2 + $0x68] sm:$0xff] }
  0x15   :  { %v678_v44 = vld [vmem:[#allocation2 + $0x58] sm:$0xff]  ;;  %v682_v46 = vld [vmem:[#allocation2 + $0x48] sm:$0xff] }
  0x16   :  { %384 = vmatpush.msra.mxu1 %v83_v3  ;;  %v690_v53 = vld [vmem:[#allocation2 + $0x78] sm:$0xff] }
  0x17   :  { %416 = vmatpush.xpose.msk.msra.mxu0 %vm87_vm0, %v84_v2  ;;  %424 = vmatpush.xpose.msk.msra.mxu2 %vm87_vm0, %v84_v2 }
  0x1b   :  { %417 = vmatpush.xpose.msk.msra.mxu0 %vm87_vm0, %v83_v3  ;;  %425 = vmatpush.xpose.msk.msra.mxu2 %vm87_vm0, %v83_v3 }
  0x1e   :  { %418 = vmatmul.msk.f32.vlgmr.msra.gmra.mxu0 %vm87_vm0, %v81_v4  ;;  %419 = vmatmul.msk.f32.vlgmr.msra.gmra.mxu2 %vm87_vm0, %v82_v5 }
  0x9b   :  { %v123_v9 = vpop.f32.mrf.mxu0 }
  0x9c   :  { %v137_v10 = vmul.f32 %v123_v9, %v630_v6  ;;  %v133_v11 = vmul.f32 %v123_v9, %v632_v7  ;;  %v129_v12 = vmul.f32 %v123_v9, %v634_v8  ;;  %v139_v19 = vmul.f32 %v123_v9, %v642_v16 }
  0x9d   :  { %v135_v20 = vmul.f32 %v123_v9, %v644_v17  ;;  %v131_v21 = vmul.f32 %v123_v9, %v646_v18  ;;  %v143_v30 = vmul.f32 %v123_v9, %v656_v27  ;;  %v141_v31 = vmul.f32 %v123_v9, %v659_v29 }
  0x9e   :  { %v169_v13 = vsel %vm87_vm0, %v137_v10, 0.0  ;;  %v157_v14 = vsel %vm87_vm0, %v133_v11, 0.0  ;;  %v145_v15 = vsel %vm87_vm0, %v129_v12, 0.0  ;;  %v175_v24 = vsel %vm87_vm0, %v139_v19, 0.0 }
  0x9f   :  { %170 = vadd.xlane.f32.xlu2 %v169_v13  ;;  %158 = vadd.xlane.f32.xlu1 %v157_v14  ;;  %v163_v25 = vsel %vm87_vm0, %v135_v20, 0.0  ;;  %v151_v26 = vsel %vm87_vm0, %v131_v21, 0.0  ;;  %v187_v35 = vsel %vm87_vm0, %v143_v30, 0.0  ;;  %v181_v37 = vsel %vm87_vm0, %v141_v31, 0.0 }
  0xa0   :  { %146 = vadd.xlane.f32.xlu0 %v145_v15 }
  0xa1   :  { %v126_v22 = vpop.f32.mrf.mxu2 }
  0xa2   :  { %v130_v28 = vmul.f32 %v126_v22, %v651_v23  ;;  %v134_v38 = vmul.f32 %v126_v22, %v664_v33  ;;  %v136_v39 = vmul.f32 %v126_v22, %v666_v34  ;;  %v132_v40 = vmul.f32 %v126_v22, %v669_v36 }
  0xa3   :  { %v140_v47 = vmul.f32 %v126_v22, %v678_v44  ;;  %v142_v48 = vmul.f32 %v126_v22, %v680_v45  ;;  %v138_v49 = vmul.f32 %v126_v22, %v682_v46  ;;  %v144_v54 = vmul.f32 %v126_v22, %v690_v53 }
  0xa4   :  { %v148_v32 = vsel %vm87_vm0, %v130_v28, 0.0  ;;  %v160_v41 = vsel %vm87_vm0, %v134_v38, 0.0  ;;  %v166_v42 = vsel %vm87_vm0, %v136_v39, 0.0  ;;  %v154_v43 = vsel %vm87_vm0, %v132_v40, 0.0 }
  0xa5   :  { %v178_v50 = vsel %vm87_vm0, %v140_v47, 0.0  ;;  %v184_v51 = vsel %vm87_vm0, %v142_v48, 0.0  ;;  %v172_v52 = vsel %vm87_vm0, %v138_v49, 0.0  ;;  %v190_v55 = vsel %vm87_vm0, %v144_v54, 0.0 }
  0xa7   :  { %176 = vadd.xlane.f32.xlu2 %v175_v24  ;;  %164 = vadd.xlane.f32.xlu1 %v163_v25 }
  0xa8   :  { %152 = vadd.xlane.f32.xlu0 %v151_v26 }
  0xaf   :  { %188 = vadd.xlane.f32.xlu1 %v187_v35  ;;  %149 = vadd.xlane.f32.xlu2 %v148_v32 }
  0xb0   :  { %182 = vadd.xlane.f32.xlu0 %v181_v37 }
  0xb7   :  { %161 = vadd.xlane.f32.xlu1 %v160_v41  ;;  %167 = vadd.xlane.f32.xlu2 %v166_v42 }
  0xb8   :  { %155 = vadd.xlane.f32.xlu0 %v154_v43 }
  0xbf   :  { %179 = vadd.xlane.f32.xlu1 %v178_v50  ;;  %185 = vadd.xlane.f32.xlu2 %v184_v51 }
  0xc0   :  { %173 = vadd.xlane.f32.xlu0 %v172_v52 }
  0xc8   :  { %191 = vadd.xlane.f32.xlu0 %v190_v55 }
 0x112   :  { %v159_v56 = vpop.xlane.xlu1 %158  ;;  %v171_v57 = vpop.xlane.xlu2 %170 }
 0x113   :  { %v147_v58 = vpop.xlane.xlu0 %146 }
 0x114   :  { %v193_v63 = vmax.f32 %v147_v58, %v159_v56 }
 0x116   :  { %v195_v2 = vmax.f32 %v193_v63, %v171_v57 }
 0x11a   :  { %v165_v59 = vpop.xlane.xlu1 %164  ;;  %v177_v61 = vpop.xlane.xlu2 %176 }
 0x11b   :  { %v153_v60 = vpop.xlane.xlu0 %152 }
 0x11c   :  { %v194_v62 = vmax.f32 %v153_v60, %v165_v59 }
 0x11e   :  { %v196_v0 = vmax.f32 %v194_v62, %v177_v61 }
 0x122   :  { %v189_v1 = vpop.xlane.xlu1 %188  ;;  %v150_v10 = vpop.xlane.xlu2 %149 }
 0x123   :  { %v198_v3 = vmax.f32 %v196_v0, %v189_v1  ;;  %v183_v4 = vpop.xlane.xlu0 %182 }
 0x124   :  { %v197_v5 = vmax.f32 %v195_v2, %v183_v4 }
 0x126   :  { %v199_v9 = vmax.f32 %v197_v5, %v198_v3 }
 0x128   :  { %v207_v11 = vsub.f32 %v147_v58, %v199_v9  ;;  %v209_v12 = vsub.f32 %v153_v60, %v199_v9  ;;  %v211_v13 = vsub.f32 %v159_v56, %v199_v9  ;;  %v213_v14 = vsub.f32 %v165_v59, %v199_v9 }
 0x129   :  { %v215_v20 = vsub.f32 %v171_v57, %v199_v9  ;;  %v217_v24 = vsub.f32 %v177_v61, %v199_v9  ;;  %v219_v28 = vsub.f32 %v183_v4, %v199_v9  ;;  %v221_v31 = vsub.f32 %v189_v1, %v199_v9 }
 0x12a   :  { %v223_v15 = vmul.f32 1.442695, %v207_v11  ;;  %v227_v19 = vmul.f32 1.442695, %v209_v12  ;;  %v231_v21 = vmul.f32 1.442695, %v211_v13  ;;  %v162_v26 = vpop.xlane.xlu1 %161  ;;  %v168_v35 = vpop.xlane.xlu2 %167 }
 0x12b   :  { %v156_v22 = vpop.xlane.xlu0 %155  ;;  %v235_v25 = vmul.f32 1.442695, %v213_v14  ;;  %v239_v30 = vmul.f32 1.442695, %v215_v20  ;;  %v243_v32 = vmul.f32 1.442695, %v217_v24  ;;  %v200_v48 = vmax.f32 %v150_v10, %v162_v26 }
 0x12c   :  { %433 = vpow2.f32 %v223_v15  ;;  %v247_v39 = vmul.f32 1.442695, %v219_v28  ;;  %v251_v43 = vmul.f32 1.442695, %v221_v31  ;;  %v201_v52 = vmax.f32 %v156_v22, %v168_v35 }
 0x12d   :  { %435 = vpow2.f32 %v227_v19 }
 0x12e   :  { %437 = vpow2.f32 %v231_v21 }
 0x12f   :  { %439 = vpow2.f32 %v235_v25 }
 0x130   :  { %441 = vpow2.f32 %v239_v30 }
 0x131   :  { %443 = vpow2.f32 %v243_v32 }
 0x132   :  { %v694_v37 = vpop.eup %433  ;;  %445 = vpow2.f32 %v247_v39  ;;  %v180_v50 = vpop.xlane.xlu1 %179 }
 0x133   :  { %v696_v38 = vpop.eup %435  ;;  %v174_v40 = vpop.xlane.xlu0 %173  ;;  %447 = vpow2.f32 %v251_v43  ;;  %v203_v57 = vmax.f32 %v201_v52, %v180_v50 }
 0x134   :  { %v255_v41 = vadd.f32 %v696_v38, %v694_v37  ;;  %v700_v42 = vpop.eup %437  ;;  %v202_v54 = vmax.f32 %v200_v48, %v174_v40  ;;  %v186_v59 = vpop.xlane.xlu2 %185 }
 0x135   :  { %v703_v49 = vpop.eup %439 }
 0x136   :  { %v256_v47 = vadd.f32 %v700_v42, %v255_v41  ;;  %v706_v55 = vpop.eup %441  ;;  %v204_v62 = vmax.f32 %v202_v54, %v186_v59 }
 0x137   :  { %v709_v58 = vpop.eup %443 }
 0x138   :  { %v257_v51 = vadd.f32 %v703_v49, %v256_v47  ;;  %v712_v0 = vpop.eup %445 }
 0x139   :  { %v715_v3 = vpop.eup %447 }
 0x13a   :  { %v258_v56 = vadd.f32 %v706_v55, %v257_v51 }
 0x13b   :  { %v192_v60 = vpop.xlane.xlu0 %191 }
 0x13c   :  { %v259_v61 = vadd.f32 %v709_v58, %v258_v56  ;;  %v205_v63 = vmax.f32 %v203_v57, %v192_v60 }
 0x13e   :  { %v260_v1 = vadd.f32 %v712_v0, %v259_v61  ;;  %v206_v2 = vmax.f32 %v204_v62, %v205_v63 }
 0x140   :  { %v261_v4 = vadd.f32 %v715_v3, %v260_v1  ;;  %v208_v5 = vsub.f32 %v150_v10, %v206_v2  ;;  %v210_v9 = vsub.f32 %v156_v22, %v206_v2  ;;  %v212_v11 = vsub.f32 %v162_v26, %v206_v2 }
 0x141   :  { %v214_v12 = vsub.f32 %v168_v35, %v206_v2  ;;  %v216_v15 = vsub.f32 %v174_v40, %v206_v2  ;;  %v218_v20 = vsub.f32 %v180_v50, %v206_v2  ;;  %v220_v25 = vsub.f32 %v186_v59, %v206_v2 }
 0x142   :  { %449 = vrcp.f32 %v261_v4  ;;  %v225_v13 = vmul.f32 1.442695, %v208_v5  ;;  %v229_v14 = vmul.f32 1.442695, %v210_v9  ;;  %v233_v19 = vmul.f32 1.442695, %v212_v11 }
 0x143   :  { %v237_v21 = vmul.f32 1.442695, %v214_v12  ;;  %v241_v28 = vmul.f32 1.442695, %v216_v15  ;;  %v222_v31 = vsub.f32 %v192_v60, %v206_v2  ;;  %v245_v10 = vmul.f32 1.442695, %v218_v20 }
 0x144   :  { %451 = vpow2.f32 %v225_v13  ;;  %v280_v35 = vand.u32 2147483648, %v261_v4  ;;  %v249_v39 = vmul.f32 1.442695, %v220_v25  ;;  %v278_v41 = vand.u32 2147483647, %v261_v4 }
 0x145   :  { %453 = vpow2.f32 %v229_v14  ;;  %v253_v48 = vmul.f32 1.442695, %v222_v31  ;;  %vm274_vm2 = vweird.f32 %v261_v4 }
 0x146   :  { %455 = vpow2.f32 %v233_v19  ;;  %v281_v54 = vor.u32 1.1754944e-38, %v280_v35  ;;  %vm279_vm4 = vcmp.eq.f32.partialorder %v278_v41, 8.507059e+37 }
 0x147   :  { %457 = vpow2.f32 %v237_v21 }
 0x148   :  { %v450_v24 = vpop.eup %449  ;;  %459 = vpow2.f32 %v241_v28 }
 0x149   :  { %v270_v30 = vmul.f32 %v450_v24, %v261_v4  ;;  %vm275_vm1 = vweird.f32 %v450_v24  ;;  %461 = vpow2.f32 %v245_v10 }
 0x14a   :  { %v718_v22 = vpop.eup %451  ;;  %vm276_vm3 = vmor %vm274_vm2, %vm275_vm1  ;;  %463 = vpow2.f32 %v249_v39 }
 0x14b   :  { %v271_v26 = vsub.f32 1.0, %v270_v30  ;;  %v720_v32 = vpop.eup %453  ;;  %465 = vpow2.f32 %v253_v48 }
 0x14c   :  { %v262_v43 = vadd.f32 %v720_v32, %v718_v22  ;;  %v724_v47 = vpop.eup %455 }
 0x14d   :  { %v272_v40 = vmul.f32 %v450_v24, %v271_v26  ;;  %v727_v52 = vpop.eup %457 }
 0x14e   :  { %v263_v51 = vadd.f32 %v724_v47, %v262_v43  ;;  %v460_v59 = vpop.eup %459 }
 0x14f   :  { %v273_v50 = vadd.f32 %v450_v24, %v272_v40  ;;  %v462_v1 = vpop.eup %461 }
 0x150   :  { %v264_v57 = vadd.f32 %v727_v52, %v263_v51  ;;  %v464_v12 = vpop.eup %463 }
 0x151   :  { %v277_v56 = vsel %vm276_vm3, %v450_v24, %v273_v50  ;;  %v466_v19 = vpop.eup %465 }
 0x152   :  { %v282_v60 = vsel %vm279_vm4, %v281_v54, %v277_v56  ;;  %v265_v61 = vadd.f32 %v460_v59, %v264_v57 }
 0x153   :  { %v283_v62 = vmul.f32 %v694_v37, %v282_v60  ;;  %v299_v63 = vmul.f32 %v696_v38, %v282_v60  ;;  %v301_v2 = vmul.f32 %v700_v42, %v282_v60  ;;  %v303_v5 = vmul.f32 %v703_v49, %v282_v60 }
 0x154   :  { %v266_v4 = vadd.f32 %v462_v1, %v265_v61  ;;  %v305_v14 = vmul.f32 %v706_v55, %v282_v60  ;;  %v307_v42 = vmul.f32 %v709_v58, %v282_v60 }
 0x155   :  { %v313_v9 = vmul.f32 %v283_v62, %v634_v8  ;;  %v315_v11 = vmul.f32 %v299_v63, %v646_v18  ;;  %v317_v15 = vmul.f32 %v301_v2, %v632_v7  ;;  %v319_v49 = vmul.f32 %v303_v5, %v644_v17 }
 0x156   :  { %v267_v13 = vadd.f32 %v464_v12, %v266_v4  ;;  %v309_v8 = vmul.f32 %v712_v0, %v282_v60  ;;  %v321_v18 = vmul.f32 %v305_v14, %v630_v6  ;;  %v311_v7 = vmul.f32 %v715_v3, %v282_v60 }
 0x157   :  { %v329_v37 = vsel %vm87_vm0, %v313_v9, 0.0  ;;  %v330_v38 = vsel %vm87_vm0, %v315_v11, 0.0  ;;  %v332_v55 = vsel %vm87_vm0, %v317_v15, 0.0  ;;  %v323_v25 = vmul.f32 %v307_v42, %v642_v16 }
 0x158   :  { %v268_v20 = vadd.f32 %v466_v19, %v267_v13  ;;  %v331_v21 = vadd.f32 %v330_v38, %v329_v37  ;;  %v334_v28 = vsel %vm87_vm0, %v319_v49, 0.0  ;;  %v325_v58 = vmul.f32 %v309_v8, %v659_v29 }
 0x159   :  { %v336_v17 = vsel %vm87_vm0, %v321_v18, 0.0  ;;  %v327_v0 = vmul.f32 %v311_v7, %v656_v27  ;;  %v338_v6 = vsel %vm87_vm0, %v323_v25, 0.0 }
 0x15a   :  { %467 = vrcp.f32 %v268_v20  ;;  %v333_v24 = vadd.f32 %v332_v55, %v331_v21  ;;  %v340_v39 = vsel %vm87_vm0, %v325_v58, 0.0  ;;  %v295_v16 = vand.u32 2147483648, %v268_v20 }
 0x15b   :  { %v342_v41 = vsel %vm87_vm0, %v327_v0, 0.0  ;;  %v293_v29 = vand.u32 2147483647, %v268_v20  ;;  %vm289_vm6 = vweird.f32 %v268_v20 }
 0x15c   :  { %v335_v30 = vadd.f32 %v334_v28, %v333_v24  ;;  %v296_v27 = vor.u32 1.1754944e-38, %v295_v16 }
 0x15d   :  { %vm294_vm8 = vcmp.eq.f32.partialorder %v293_v29, 8.507059e+37 }
 0x15e   :  { %v337_v31 = vadd.f32 %v336_v17, %v335_v30 }
 0x160   :  { %v468_v10 = vpop.eup %467  ;;  %v339_v35 = vadd.f32 %v338_v6, %v337_v31 }
 0x161   :  { %v285_v26 = vmul.f32 %v468_v10, %v268_v20  ;;  %vm290_vm5 = vweird.f32 %v468_v10 }
 0x162   :  { %v341_v40 = vadd.f32 %v340_v39, %v339_v35  ;;  %vm291_vm7 = vmor %vm289_vm6, %vm290_vm5 }
 0x163   :  { %v286_v3 = vsub.f32 1.0, %v285_v26 }
 0x164   :  { %v343_v48 = vadd.f32 %v342_v41, %v341_v40 }
 0x165   :  { %v287_v43 = vmul.f32 %v468_v10, %v286_v3 }
 0x166   :  { %420 = vmatmul.msk.f32.vlgmr.msra.gmra.mxu1 %vm87_vm0, %v343_v48 }
 0x167   :  { %v288_v50 = vadd.f32 %v468_v10, %v287_v43 }
 0x169   :  { %v292_v51 = vsel %vm291_vm7, %v468_v10, %v288_v50 }
 0x16a   :  { %v297_v54 = vsel %vm294_vm8, %v296_v27, %v292_v51 }
 0x16b   :  { %v298_v56 = vmul.f32 %v718_v22, %v297_v54  ;;  %v300_v57 = vmul.f32 %v720_v32, %v297_v54  ;;  %v302_v60 = vmul.f32 %v724_v47, %v297_v54  ;;  %v304_v61 = vmul.f32 %v727_v52, %v297_v54 }
 0x16c   :  { %v306_v62 = vmul.f32 %v460_v59, %v297_v54  ;;  %v308_v5 = vmul.f32 %v462_v1, %v297_v54  ;;  %v310_v32 = vmul.f32 %v464_v12, %v297_v54  ;;  %v312_v14 = vmul.f32 %v466_v19, %v297_v54 }
 0x16d   :  { %v314_v63 = vmul.f32 %v298_v56, %v651_v23  ;;  %v316_v2 = vmul.f32 %v300_v57, %v669_v36  ;;  %v318_v4 = vmul.f32 %v302_v60, %v664_v33  ;;  %v320_v9 = vmul.f32 %v304_v61, %v666_v34 }
 0x16e   :  { %v322_v47 = vmul.f32 %v306_v62, %v682_v46  ;;  %v324_v23 = vmul.f32 %v308_v5, %v678_v44  ;;  %v326_v1 = vmul.f32 %v310_v32, %v680_v45  ;;  %v328_v37 = vmul.f32 %v312_v14, %v690_v53  ;;  %v432_v44 = vld [vmem:[%s790_s3] ss:$0 sm:$0xff] }
 0x16f   :  { %v344_v11 = vsel %vm87_vm0, %v314_v63, 0.0  ;;  %v345_v22 = vsel %vm87_vm0, %v316_v2, 0.0  ;;  %v347_v52 = vsel %vm87_vm0, %v318_v4, 0.0  ;;  %v349_v36 = vsel %vm87_vm0, %v320_v9, 0.0 }
 0x170   :  { %v346_v13 = vadd.f32 %v345_v22, %v344_v11  ;;  %v351_v34 = vsel %vm87_vm0, %v322_v47, 0.0  ;;  %v353_v12 = vsel %vm87_vm0, %v324_v23, 0.0  ;;  %v355_v46 = vsel %vm87_vm0, %v326_v1, 0.0 }
 0x171   :  { %v357_v19 = vsel %vm87_vm0, %v328_v37, 0.0 }
 0x172   :  { %v348_v59 = vadd.f32 %v347_v52, %v346_v13 }
 0x174   :  { %v350_v33 = vadd.f32 %v349_v36, %v348_v59 }
 0x176   :  { %v352_v15 = vadd.f32 %v351_v34, %v350_v33 }
 0x178   :  { %v354_v38 = vadd.f32 %v353_v12, %v352_v15 }
 0x17a   :  { %v356_v20 = vadd.f32 %v355_v46, %v354_v38 }
 0x17c   :  { %v358_v42 = vadd.f32 %v357_v19, %v356_v20 }
 0x17e   :  { %421 = vmatmul.msk.f32.gmra.mxu1 %vm87_vm0, %v358_v42 }
 0x1e3   :  { %v386_v45 = vpop.f32.mrf.mxu1 }
 0x1e4   :  { %v387_v49 = vadd.f32 %v432_v44, %v386_v45 }
 0x1e6   :  { %392 = vst.msk [vmem:[#allocation8] sm:$0xff] %vm87_vm0, %v387_v49 }
 0x1fb   :  { %v389_v53 = vpop.f32.mrf.mxu1 }
 0x1fc   :  { %v390_v21 = vadd.f32 %v432_v44, %v389_v53 }
 0x1fe   :  { %393 = vst.msk [vmem:[#allocation8 + $0x8] sm:$0xff] %vm87_vm0, %v390_v21 }
 0x1ff   :  { %406 = dma.vmem_to_hbm [thread:$0]  %s399_s6, 256, %s401_s9, [#allocation4], %s572_s23, %s572_s23, %s573_s24  }
 0x200   :  { %569 = dma.done.wait [#allocation4], 256  }
 0x201   :  { %570 = vsyncadd [#allocation4], 4294967040 }
 0x202   :  { %411 = vsyncpa [#allocation3], 1 }
 0x203   :  { %412 = vsyncpa [#allocation6], 1 }
 0x204   :  { %413 = vsyncpa [#allocation4], 1 }

// kernel: tpu_custom_call.1
= control target key start
LH: loop header
LB: loop body
LE: loop exit
PB: predicated region body
PF: predicated region fallthrough
CT: control target
= control target key end

     0   :  { %9 = vsyncpa [#allocation3], 0  ;;  %s787_s0 = inlined_call_operand.hbm [shape: f32[8,16,32], index: 0, kind: input, shape index: {}]   ;;  %s788_s1 = inlined_call_operand.hbm [shape: f32[16,32], index: 1, kind: input, shape index: {}]   ;;  %s789_s2 = inlined_call_operand.hbm [shape: f32[32,32], index: 2, kind: input, shape index: {}]   ;;  %s790_s3 = inlined_call_operand.vmem [shape: f32[1,32], index: 3, kind: input, shape index: {}]   ;;  %s791_s4 = inlined_call_operand.hbm [shape: f32[16,32], index: 4, kind: output, shape index: {}]  }
   0x1   :  { %10 = vsyncpa [#allocation6], 0 }
   0x2   :  { %11 = vsyncpa [#allocation4], 0  ;;  %s29_s17 = sshll.u32 %s788_s1, 4  ;;  %s571_s18 = smov [#allocation5]   ;;  %s30_s17 = int_to_ptr.hbm [resolvable:$true] %s29_s17 }
   0x3   :  { %s31_s19 = sshll.u32 %s571_s18, 4  ;;  %s16_s22 = sshll.u32 %s787_s0, 4  ;;  %s32_s19 = int_to_ptr.vmem [resolvable:$true] %s31_s19  ;;  %s17_s22 = int_to_ptr.hbm [resolvable:$true] %s16_s22 }
   0x4   :  { %s572_s23 = smov 128   ;;  %s573_s24 = smov 8  }
   0x5   :  { %37 = dma.hbm_to_vmem [thread:$0]  %s30_s17, 256, %s32_s19, [#allocation6], %s572_s23, %s572_s23, %s573_s24  }
   0x6   :  { %s574_s25 = smov [#allocation2]   ;;  %s42_s1 = sshll.u32 %s789_s2, 4  ;;  %s43_s1 = int_to_ptr.hbm [resolvable:$true] %s42_s1 }
   0x7   :  { %s18_s26 = sshll.u32 %s574_s25, 4  ;;  %s575_s0 = smov [#allocation7]   ;;  %s19_s26 = int_to_ptr.vmem [resolvable:$true] %s18_s26 }
   0x8   :  { %24 = dma.hbm_to_vmem [thread:$0]  %s17_s22, 2048, %s19_s26, [#allocation3], %s572_s23, %s572_s23, %s573_s24  }
   0x9   :  { %s44_s29 = sshll.u32 %s575_s0, 4  ;;  %s45_s29 = int_to_ptr.vmem [resolvable:$true] %s44_s29 }
   0xa   :  { %50 = dma.hbm_to_vmem [thread:$0]  %s43_s1, 512, %s45_s29, [#allocation6], %s572_s23, %s572_s23, %s573_s24  }
   0xb   :  { %565 = dma.done.wait [#allocation3], 2048  }
   0xc   :  { %566 = vsyncadd [#allocation3], 4294965248 }
   0xd   :  { %567 = dma.done.wait [#allocation6], 768  }
   0xe   :  { %568 = vsyncadd [#allocation6], 4294966528  ;;  %vm87_vm0 = vcmask 261120   ;;  %v86_v0 = vld [vmem:[#allocation7 + $0x18] sm:$0xff]  ;;  %v85_v1 = vld [vmem:[#allocation7 + $0x10] sm:$0xff]  ;;  %s576_s5 = smov [#allocation8]  }
   0xf   :  { %414 = vmatpush.xpose.msk.msra.mxu0 %vm87_vm0, %v86_v0  ;;  %422 = vmatpush.xpose.msk.msra.mxu2 %vm87_vm0, %v86_v0  ;;  %v84_v2 = vld [vmem:[#allocation7 + $0x8] sm:$0xff]  ;;  %v83_v3 = vld [vmem:[#allocation7] sm:$0xff]  ;;  %v81_v4 = vld [vmem:[#allocation5] sm:$0xff]  ;;  %s398_s6 = sshll.u32 %s576_s5, 4  ;;  %s400_s9 = sshll.u32 %s791_s4, 4  ;;  %s399_s6 = int_to_ptr.vmem [resolvable:$true] %s398_s6  ;;  %s401_s9 = int_to_ptr.hbm [resolvable:$true] %s400_s9 }
  0x10   :  { %381 = vmatpush.msra.mxu1 %v86_v0  ;;  %v82_v5 = vld [vmem:[#allocation5 + $0x8] sm:$0xff]  ;;  %v630_v6 = vld [vmem:[#allocation2 + $0x40] sm:$0xff]  ;;  %v642_v16 = vld [vmem:[#allocation2 + $0x50] sm:$0xff] }
  0x11   :  { %v632_v7 = vld [vmem:[#allocation2 + $0x20] sm:$0xff]  ;;  %v644_v17 = vld [vmem:[#allocation2 + $0x30] sm:$0xff]  ;;  %v651_v23 = vld [vmem:[#allocation2 + $0x8] sm:$0xff] }
  0x12   :  { %382 = vmatpush.msra.mxu1 %v85_v1  ;;  %v634_v8 = vld [vmem:[#allocation2] sm:$0xff]  ;;  %v646_v18 = vld [vmem:[#allocation2 + $0x10] sm:$0xff]  ;;  %v664_v33 = vld [vmem:[#allocation2 + $0x28] sm:$0xff] }
  0x13   :  { %415 = vmatpush.xpose.msk.msra.mxu0 %vm87_vm0, %v85_v1  ;;  %423 = vmatpush.xpose.msk.msra.mxu2 %vm87_vm0, %v85_v1  ;;  %v656_v27 = vld [vmem:[#allocation2 + $0x70] sm:$0xff]  ;;  %v659_v29 = vld [vmem:[#allocation2 + $0x60] sm:$0xff]  ;;  %v666_v34 = vld [vmem:[#allocation2 + $0x38] sm:$0xff] }
  0x14   :  { %383 = vmatpush.msra.mxu1 %v84_v2  ;;  %v669_v36 = vld [vmem:[#allocation2 + $0x18] sm:$0xff]  ;;  %v680_v45 = vld [vmem:[#allocation2 + $0x68] sm:$0xff] }
  0x15   :  { %v678_v44 = vld [vmem:[#allocation2 + $0x58] sm:$0xff]  ;;  %v682_v46 = vld [vmem:[#allocation2 + $0x48] sm:$0xff] }
  0x16   :  { %384 = vmatpush.msra.mxu1 %v83_v3  ;;  %v690_v53 = vld [vmem:[#allocation2 + $0x78] sm:$0xff] }
  0x17   :  { %416 = vmatpush.xpose.msk.msra.mxu0 %vm87_vm0, %v84_v2  ;;  %424 = vmatpush.xpose.msk.msra.mxu2 %vm87_vm0, %v84_v2 }
  0x1b   :  { %417 = vmatpush.xpose.msk.msra.mxu0 %vm87_vm0, %v83_v3  ;;  %425 = vmatpush.xpose.msk.msra.mxu2 %vm87_vm0, %v83_v3 }
  0x1e   :  { %418 = vmatmul.msk.f32.vlgmr.msra.gmra.mxu0 %vm87_vm0, %v81_v4  ;;  %419 = vmatmul.msk.f32.vlgmr.msra.gmra.mxu2 %vm87_vm0, %v82_v5 }
  0x9b   :  { %v123_v9 = vpop.f32.mrf.mxu0 }
  0x9c   :  { %v137_v10 = vmul.f32 %v123_v9, %v630_v6  ;;  %v133_v11 = vmul.f32 %v123_v9, %v632_v7  ;;  %v129_v12 = vmul.f32 %v123_v9, %v634_v8  ;;  %v139_v19 = vmul.f32 %v123_v9, %v642_v16 }
  0x9d   :  { %v135_v20 = vmul.f32 %v123_v9, %v644_v17  ;;  %v131_v21 = vmul.f32 %v123_v9, %v646_v18  ;;  %v143_v30 = vmul.f32 %v123_v9, %v656_v27  ;;  %v141_v31 = vmul.f32 %v123_v9, %v659_v29 }
  0x9e   :  { %v169_v13 = vsel %vm87_vm0, %v137_v10, 0.0  ;;  %v157_v14 = vsel %vm87_vm0, %v133_v11, 0.0  ;;  %v145_v15 = vsel %vm87_vm0, %v129_v12, 0.0  ;;  %v175_v24 = vsel %vm87_vm0, %v139_v19, 0.0 }
  0x9f   :  { %170 = vadd.xlane.f32.xlu2 %v169_v13  ;;  %158 = vadd.xlane.f32.xlu1 %v157_v14  ;;  %v163_v25 = vsel %vm87_vm0, %v135_v20, 0.0  ;;  %v151_v26 = vsel %vm87_vm0, %v131_v21, 0.0  ;;  %v187_v35 = vsel %vm87_vm0, %v143_v30, 0.0  ;;  %v181_v37 = vsel %vm87_vm0, %v141_v31, 0.0 }
  0xa0   :  { %146 = vadd.xlane.f32.xlu0 %v145_v15 }
  0xa1   :  { %v126_v22 = vpop.f32.mrf.mxu2 }
  0xa2   :  { %v130_v28 = vmul.f32 %v126_v22, %v651_v23  ;;  %v134_v38 = vmul.f32 %v126_v22, %v664_v33  ;;  %v136_v39 = vmul.f32 %v126_v22, %v666_v34  ;;  %v132_v40 = vmul.f32 %v126_v22, %v669_v36 }
  0xa3   :  { %v140_v47 = vmul.f32 %v126_v22, %v678_v44  ;;  %v142_v48 = vmul.f32 %v126_v22, %v680_v45  ;;  %v138_v49 = vmul.f32 %v126_v22, %v682_v46  ;;  %v144_v54 = vmul.f32 %v126_v22, %v690_v53 }
  0xa4   :  { %v148_v32 = vsel %vm87_vm0, %v130_v28, 0.0  ;;  %v160_v41 = vsel %vm87_vm0, %v134_v38, 0.0  ;;  %v166_v42 = vsel %vm87_vm0, %v136_v39, 0.0  ;;  %v154_v43 = vsel %vm87_vm0, %v132_v40, 0.0 }
  0xa5   :  { %v178_v50 = vsel %vm87_vm0, %v140_v47, 0.0  ;;  %v184_v51 = vsel %vm87_vm0, %v142_v48, 0.0  ;;  %v172_v52 = vsel %vm87_vm0, %v138_v49, 0.0  ;;  %v190_v55 = vsel %vm87_vm0, %v144_v54, 0.0 }
  0xa7   :  { %176 = vadd.xlane.f32.xlu2 %v175_v24  ;;  %164 = vadd.xlane.f32.xlu1 %v163_v25 }
  0xa8   :  { %152 = vadd.xlane.f32.xlu0 %v151_v26 }
  0xaf   :  { %188 = vadd.xlane.f32.xlu1 %v187_v35  ;;  %149 = vadd.xlane.f32.xlu2 %v148_v32 }
  0xb0   :  { %182 = vadd.xlane.f32.xlu0 %v181_v37 }
  0xb7   :  { %161 = vadd.xlane.f32.xlu1 %v160_v41  ;;  %167 = vadd.xlane.f32.xlu2 %v166_v42 }
  0xb8   :  { %155 = vadd.xlane.f32.xlu0 %v154_v43 }
  0xbf   :  { %179 = vadd.xlane.f32.xlu1 %v178_v50  ;;  %185 = vadd.xlane.f32.xlu2 %v184_v51 }
  0xc0   :  { %173 = vadd.xlane.f32.xlu0 %v172_v52 }
  0xc8   :  { %191 = vadd.xlane.f32.xlu0 %v190_v55 }
 0x112   :  { %v159_v56 = vpop.xlane.xlu1 %158  ;;  %v171_v57 = vpop.xlane.xlu2 %170 }
 0x113   :  { %v147_v58 = vpop.xlane.xlu0 %146 }
 0x114   :  { %v193_v63 = vmax.f32 %v147_v58, %v159_v56 }
 0x116   :  { %v195_v2 = vmax.f32 %v193_v63, %v171_v57 }
 0x11a   :  { %v165_v59 = vpop.xlane.xlu1 %164  ;;  %v177_v61 = vpop.xlane.xlu2 %176 }
 0x11b   :  { %v153_v60 = vpop.xlane.xlu0 %152 }
 0x11c   :  { %v194_v62 = vmax.f32 %v153_v60, %v165_v59 }
 0x11e   :  { %v196_v0 = vmax.f32 %v194_v62, %v177_v61 }
 0x122   :  { %v189_v1 = vpop.xlane.xlu1 %188  ;;  %v150_v10 = vpop.xlane.xlu2 %149 }
 0x123   :  { %v198_v3 = vmax.f32 %v196_v0, %v189_v1  ;;  %v183_v4 = vpop.xlane.xlu0 %182 }
 0x124   :  { %v197_v5 = vmax.f32 %v195_v2, %v183_v4 }
 0x126   :  { %v199_v9 = vmax.f32 %v197_v5, %v198_v3 }
 0x128   :  { %v207_v11 = vsub.f32 %v147_v58, %v199_v9  ;;  %v209_v12 = vsub.f32 %v153_v60, %v199_v9  ;;  %v211_v13 = vsub.f32 %v159_v56, %v199_v9  ;;  %v213_v14 = vsub.f32 %v165_v59, %v199_v9 }
 0x129   :  { %v215_v20 = vsub.f32 %v171_v57, %v199_v9  ;;  %v217_v24 = vsub.f32 %v177_v61, %v199_v9  ;;  %v219_v28 = vsub.f32 %v183_v4, %v199_v9  ;;  %v221_v31 = vsub.f32 %v189_v1, %v199_v9 }
 0x12a   :  { %v223_v15 = vmul.f32 1.442695, %v207_v11  ;;  %v227_v19 = vmul.f32 1.442695, %v209_v12  ;;  %v231_v21 = vmul.f32 1.442695, %v211_v13  ;;  %v162_v26 = vpop.xlane.xlu1 %161  ;;  %v168_v35 = vpop.xlane.xlu2 %167 }
 0x12b   :  { %v156_v22 = vpop.xlane.xlu0 %155  ;;  %v235_v25 = vmul.f32 1.442695, %v213_v14  ;;  %v239_v30 = vmul.f32 1.442695, %v215_v20  ;;  %v243_v32 = vmul.f32 1.442695, %v217_v24  ;;  %v200_v48 = vmax.f32 %v150_v10, %v162_v26 }
 0x12c   :  { %433 = vpow2.f32 %v223_v15  ;;  %v247_v39 = vmul.f32 1.442695, %v219_v28  ;;  %v251_v43 = vmul.f32 1.442695, %v221_v31  ;;  %v201_v52 = vmax.f32 %v156_v22, %v168_v35 }
 0x12d   :  { %435 = vpow2.f32 %v227_v19 }
 0x12e   :  { %437 = vpow2.f32 %v231_v21 }
 0x12f   :  { %439 = vpow2.f32 %v235_v25 }
 0x130   :  { %441 = vpow2.f32 %v239_v30 }
 0x131   :  { %443 = vpow2.f32 %v243_v32 }
 0x132   :  { %v694_v37 = vpop.eup %433  ;;  %445 = vpow2.f32 %v247_v39  ;;  %v180_v50 = vpop.xlane.xlu1 %179 }
 0x133   :  { %v696_v38 = vpop.eup %435  ;;  %v174_v40 = vpop.xlane.xlu0 %173  ;;  %447 = vpow2.f32 %v251_v43  ;;  %v203_v57 = vmax.f32 %v201_v52, %v180_v50 }
 0x134   :  { %v255_v41 = vadd.f32 %v696_v38, %v694_v37  ;;  %v700_v42 = vpop.eup %437  ;;  %v202_v54 = vmax.f32 %v200_v48, %v174_v40  ;;  %v186_v59 = vpop.xlane.xlu2 %185 }
 0x135   :  { %v703_v49 = vpop.eup %439 }
 0x136   :  { %v256_v47 = vadd.f32 %v700_v42, %v255_v41  ;;  %v706_v55 = vpop.eup %441  ;;  %v204_v62 = vmax.f32 %v202_v54, %v186_v59 }
 0x137   :  { %v709_v58 = vpop.eup %443 }
 0x138   :  { %v257_v51 = vadd.f32 %v703_v49, %v256_v47  ;;  %v712_v0 = vpop.eup %445 }
 0x139   :  { %v715_v3 = vpop.eup %447 }
 0x13a   :  { %v258_v56 = vadd.f32 %v706_v55, %v257_v51 }
 0x13b   :  { %v192_v60 = vpop.xlane.xlu0 %191 }
 0x13c   :  { %v259_v61 = vadd.f32 %v709_v58, %v258_v56  ;;  %v205_v63 = vmax.f32 %v203_v57, %v192_v60 }
 0x13e   :  { %v260_v1 = vadd.f32 %v712_v0, %v259_v61  ;;  %v206_v2 = vmax.f32 %v204_v62, %v205_v63 }
 0x140   :  { %v261_v4 = vadd.f32 %v715_v3, %v260_v1  ;;  %v208_v5 = vsub.f32 %v150_v10, %v206_v2  ;;  %v210_v9 = vsub.f32 %v156_v22, %v206_v2  ;;  %v212_v11 = vsub.f32 %v162_v26, %v206_v2 }
 0x141   :  { %v214_v12 = vsub.f32 %v168_v35, %v206_v2  ;;  %v216_v15 = vsub.f32 %v174_v40, %v206_v2  ;;  %v218_v20 = vsub.f32 %v180_v50, %v206_v2  ;;  %v220_v25 = vsub.f32 %v186_v59, %v206_v2 }
 0x142   :  { %449 = vrcp.f32 %v261_v4  ;;  %v225_v13 = vmul.f32 1.442695, %v208_v5  ;;  %v229_v14 = vmul.f32 1.442695, %v210_v9  ;;  %v233_v19 = vmul.f32 1.442695, %v212_v11 }
 0x143   :  { %v237_v21 = vmul.f32 1.442695, %v214_v12  ;;  %v241_v28 = vmul.f32 1.442695, %v216_v15  ;;  %v222_v31 = vsub.f32 %v192_v60, %v206_v2  ;;  %v245_v10 = vmul.f32 1.442695, %v218_v20 }
 0x144   :  { %451 = vpow2.f32 %v225_v13  ;;  %v280_v35 = vand.u32 2147483648, %v261_v4  ;;  %v249_v39 = vmul.f32 1.442695, %v220_v25  ;;  %v278_v41 = vand.u32 2147483647, %v261_v4 }
 0x145   :  { %453 = vpow2.f32 %v229_v14  ;;  %v253_v48 = vmul.f32 1.442695, %v222_v31  ;;  %vm274_vm2 = vweird.f32 %v261_v4 }
 0x146   :  { %455 = vpow2.f32 %v233_v19  ;;  %v281_v54 = vor.u32 1.1754944e-38, %v280_v35  ;;  %vm279_vm4 = vcmp.eq.f32.partialorder %v278_v41, 8.507059e+37 }
 0x147   :  { %457 = vpow2.f32 %v237_v21 }
 0x148   :  { %v450_v24 = vpop.eup %449  ;;  %459 = vpow2.f32 %v241_v28 }
 0x149   :  { %v270_v30 = vmul.f32 %v450_v24, %v261_v4  ;;  %vm275_vm1 = vweird.f32 %v450_v24  ;;  %461 = vpow2.f32 %v245_v10 }
 0x14a   :  { %v718_v22 = vpop.eup %451  ;;  %vm276_vm3 = vmor %vm274_vm2, %vm275_vm1  ;;  %463 = vpow2.f32 %v249_v39 }
 0x14b   :  { %v271_v26 = vsub.f32 1.0, %v270_v30  ;;  %v720_v32 = vpop.eup %453  ;;  %465 = vpow2.f32 %v253_v48 }
 0x14c   :  { %v262_v43 = vadd.f32 %v720_v32, %v718_v22  ;;  %v724_v47 = vpop.eup %455 }
 0x14d   :  { %v272_v40 = vmul.f32 %v450_v24, %v271_v26  ;;  %v727_v52 = vpop.eup %457 }
 0x14e   :  { %v263_v51 = vadd.f32 %v724_v47, %v262_v43  ;;  %v460_v59 = vpop.eup %459 }
 0x14f   :  { %v273_v50 = vadd.f32 %v450_v24, %v272_v40  ;;  %v462_v1 = vpop.eup %461 }
 0x150   :  { %v264_v57 = vadd.f32 %v727_v52, %v263_v51  ;;  %v464_v12 = vpop.eup %463 }
 0x151   :  { %v277_v56 = vsel %vm276_vm3, %v450_v24, %v273_v50  ;;  %v466_v19 = vpop.eup %465 }
 0x152   :  { %v282_v60 = vsel %vm279_vm4, %v281_v54, %v277_v56  ;;  %v265_v61 = vadd.f32 %v460_v59, %v264_v57 }
 0x153   :  { %v283_v62 = vmul.f32 %v694_v37, %v282_v60  ;;  %v299_v63 = vmul.f32 %v696_v38, %v282_v60  ;;  %v301_v2 = vmul.f32 %v700_v42, %v282_v60  ;;  %v303_v5 = vmul.f32 %v703_v49, %v282_v60 }
 0x154   :  { %v266_v4 = vadd.f32 %v462_v1, %v265_v61  ;;  %v305_v14 = vmul.f32 %v706_v55, %v282_v60  ;;  %v307_v42 = vmul.f32 %v709_v58, %v282_v60 }
 0x155   :  { %v313_v9 = vmul.f32 %v283_v62, %v634_v8  ;;  %v315_v11 = vmul.f32 %v299_v63, %v646_v18  ;;  %v317_v15 = vmul.f32 %v301_v2, %v632_v7  ;;  %v319_v49 = vmul.f32 %v303_v5, %v644_v17 }
 0x156   :  { %v267_v13 = vadd.f32 %v464_v12, %v266_v4  ;;  %v309_v8 = vmul.f32 %v712_v0, %v282_v60  ;;  %v321_v18 = vmul.f32 %v305_v14, %v630_v6  ;;  %v311_v7 = vmul.f32 %v715_v3, %v282_v60 }
 0x157   :  { %v329_v37 = vsel %vm87_vm0, %v313_v9, 0.0  ;;  %v330_v38 = vsel %vm87_vm0, %v315_v11, 0.0  ;;  %v332_v55 = vsel %vm87_vm0, %v317_v15, 0.0  ;;  %v323_v25 = vmul.f32 %v307_v42, %v642_v16 }
 0x158   :  { %v268_v20 = vadd.f32 %v466_v19, %v267_v13  ;;  %v331_v21 = vadd.f32 %v330_v38, %v329_v37  ;;  %v334_v28 = vsel %vm87_vm0, %v319_v49, 0.0  ;;  %v325_v58 = vmul.f32 %v309_v8, %v659_v29 }
 0x159   :  { %v336_v17 = vsel %vm87_vm0, %v321_v18, 0.0  ;;  %v327_v0 = vmul.f32 %v311_v7, %v656_v27  ;;  %v338_v6 = vsel %vm87_vm0, %v323_v25, 0.0 }
 0x15a   :  { %467 = vrcp.f32 %v268_v20  ;;  %v333_v24 = vadd.f32 %v332_v55, %v331_v21  ;;  %v340_v39 = vsel %vm87_vm0, %v325_v58, 0.0  ;;  %v295_v16 = vand.u32 2147483648, %v268_v20 }
 0x15b   :  { %v342_v41 = vsel %vm87_vm0, %v327_v0, 0.0  ;;  %v293_v29 = vand.u32 2147483647, %v268_v20  ;;  %vm289_vm6 = vweird.f32 %v268_v20 }
 0x15c   :  { %v335_v30 = vadd.f32 %v334_v28, %v333_v24  ;;  %v296_v27 = vor.u32 1.1754944e-38, %v295_v16 }
 0x15d   :  { %vm294_vm8 = vcmp.eq.f32.partialorder %v293_v29, 8.507059e+37 }
 0x15e   :  { %v337_v31 = vadd.f32 %v336_v17, %v335_v30 }
 0x160   :  { %v468_v10 = vpop.eup %467  ;;  %v339_v35 = vadd.f32 %v338_v6, %v337_v31 }
 0x161   :  { %v285_v26 = vmul.f32 %v468_v10, %v268_v20  ;;  %vm290_vm5 = vweird.f32 %v468_v10 }
 0x162   :  { %v341_v40 = vadd.f32 %v340_v39, %v339_v35  ;;  %vm291_vm7 = vmor %vm289_vm6, %vm290_vm5 }
 0x163   :  { %v286_v3 = vsub.f32 1.0, %v285_v26 }
 0x164   :  { %v343_v48 = vadd.f32 %v342_v41, %v341_v40 }
 0x165   :  { %v287_v43 = vmul.f32 %v468_v10, %v286_v3 }
 0x166   :  { %420 = vmatmul.msk.f32.vlgmr.msra.gmra.mxu1 %vm87_vm0, %v343_v48 }
 0x167   :  { %v288_v50 = vadd.f32 %v468_v10, %v287_v43 }
 0x169   :  { %v292_v51 = vsel %vm291_vm7, %v468_v10, %v288_v50 }
 0x16a   :  { %v297_v54 = vsel %vm294_vm8, %v296_v27, %v292_v51 }
 0x16b   :  { %v298_v56 = vmul.f32 %v718_v22, %v297_v54  ;;  %v300_v57 = vmul.f32 %v720_v32, %v297_v54  ;;  %v302_v60 = vmul.f32 %v724_v47, %v297_v54  ;;  %v304_v61 = vmul.f32 %v727_v52, %v297_v54 }
 0x16c   :  { %v306_v62 = vmul.f32 %v460_v59, %v297_v54  ;;  %v308_v5 = vmul.f32 %v462_v1, %v297_v54  ;;  %v310_v32 = vmul.f32 %v464_v12, %v297_v54  ;;  %v312_v14 = vmul.f32 %v466_v19, %v297_v54 }
 0x16d   :  { %v314_v63 = vmul.f32 %v298_v56, %v651_v23  ;;  %v316_v2 = vmul.f32 %v300_v57, %v669_v36  ;;  %v318_v4 = vmul.f32 %v302_v60, %v664_v33  ;;  %v320_v9 = vmul.f32 %v304_v61, %v666_v34 }
 0x16e   :  { %v322_v47 = vmul.f32 %v306_v62, %v682_v46  ;;  %v324_v23 = vmul.f32 %v308_v5, %v678_v44  ;;  %v326_v1 = vmul.f32 %v310_v32, %v680_v45  ;;  %v328_v37 = vmul.f32 %v312_v14, %v690_v53  ;;  %v432_v44 = vld [vmem:[%s790_s3] ss:$0 sm:$0xff] }
 0x16f   :  { %v344_v11 = vsel %vm87_vm0, %v314_v63, 0.0  ;;  %v345_v22 = vsel %vm87_vm0, %v316_v2, 0.0  ;;  %v347_v52 = vsel %vm87_vm0, %v318_v4, 0.0  ;;  %v349_v36 = vsel %vm87_vm0, %v320_v9, 0.0 }
 0x170   :  { %v346_v13 = vadd.f32 %v345_v22, %v344_v11  ;;  %v351_v34 = vsel %vm87_vm0, %v322_v47, 0.0  ;;  %v353_v12 = vsel %vm87_vm0, %v324_v23, 0.0  ;;  %v355_v46 = vsel %vm87_vm0, %v326_v1, 0.0 }
 0x171   :  { %v357_v19 = vsel %vm87_vm0, %v328_v37, 0.0 }
 0x172   :  { %v348_v59 = vadd.f32 %v347_v52, %v346_v13 }
 0x174   :  { %v350_v33 = vadd.f32 %v349_v36, %v348_v59 }
 0x176   :  { %v352_v15 = vadd.f32 %v351_v34, %v350_v33 }
 0x178   :  { %v354_v38 = vadd.f32 %v353_v12, %v352_v15 }
 0x17a   :  { %v356_v20 = vadd.f32 %v355_v46, %v354_v38 }
 0x17c   :  { %v358_v42 = vadd.f32 %v357_v19, %v356_v20 }
 0x17e   :  { %421 = vmatmul.msk.f32.gmra.mxu1 %vm87_vm0, %v358_v42 }
 0x1e3   :  { %v386_v45 = vpop.f32.mrf.mxu1 }
 0x1e4   :  { %v387_v49 = vadd.f32 %v432_v44, %v386_v45 }
 0x1e6   :  { %392 = vst.msk [vmem:[#allocation8] sm:$0xff] %vm87_vm0, %v387_v49 }
 0x1fb   :  { %v389_v53 = vpop.f32.mrf.mxu1 }
 0x1fc   :  { %v390_v21 = vadd.f32 %v432_v44, %v389_v53 }
 0x1fe   :  { %393 = vst.msk [vmem:[#allocation8 + $0x8] sm:$0xff] %vm87_vm0, %v390_v21 }
 0x1ff   :  { %406 = dma.vmem_to_hbm [thread:$0]  %s399_s6, 256, %s401_s9, [#allocation4], %s572_s23, %s572_s23, %s573_s24  }
 0x200   :  { %569 = dma.done.wait [#allocation4], 256  }
 0x201   :  { %570 = vsyncadd [#allocation4], 4294967040 }
 0x202   :  { %411 = vsyncpa [#allocation3], 1 }
 0x203   :  { %412 = vsyncpa [#allocation6], 1 }
 0x204   :  { %413 = vsyncpa [#allocation4], 1 }

</bundles_post_ra>
